<compile_context>
chip_gen: v7x
topology: tpu7x:2x2x1
jax: 0.10.0
libtpu: 0.0.40
codegen_flags: <defaults>
</compile_context>

<pallas_src>
import functools

import jax
import jax.numpy as jnp
from jax.experimental import pallas as pl
from jax.experimental.pallas import tpu as pltpu


def _round_up(x, m):
    return ((x + m - 1) // m) * m


# --------------------------------------------------------------------------
# Kernels
# --------------------------------------------------------------------------
def _fused_mlp_single_kernel(x_ref, w_in_ref, b1_ref, w_out_ref, b_out_ref,
                             logits_ref):
    """Single K-step path: whole fused MLP for one batch tile, no scratch.

    x_ref:     [TM, K_pad]     bf16
    w_in_ref:  [K_pad, HID_pad] bf16
    b1_ref:    [1, HID_pad]     f32
    w_out_ref: [HID_pad, A_pad] bf16
    b_out_ref: [1, A_pad]       f32
    logits_ref:[TM, A_pad]      f32
    """
    h = jnp.dot(x_ref[...], w_in_ref[...], preferred_element_type=jnp.float32)
    h = jnp.maximum(h + b1_ref[...], 0.0)                       # bias + ReLU
    logits = jnp.dot(h.astype(w_out_ref.dtype), w_out_ref[...],
                     preferred_element_type=jnp.float32)
    logits_ref[...] = logits + b_out_ref[...]


def _fused_mlp_ktiled_kernel(x_ref, w_in_ref, b1_ref, w_out_ref, b_out_ref,
                             logits_ref, acc_ref, *, tk):
    """Fallback for very large K: K-tiled weight stream, f32 accumulator.

    x_ref:     [TM, K_pad]     bf16  (full K — sliced in-kernel, one DMA)
    w_in_ref:  [tk, HID_pad]   bf16  (K-tile of fused weights)
    acc_ref:   [TM, HID_pad]   f32   VMEM accumulator across K tiles
    """
    k = pl.program_id(1)

    @pl.when(k == 0)
    def _():
        acc_ref[...] = jnp.zeros_like(acc_ref)

    off = pl.multiple_of(k * tk, tk)
    acc_ref[...] += jnp.dot(x_ref[:, pl.ds(off, tk)], w_in_ref[...],
                            preferred_element_type=jnp.float32)

    @pl.when(k == pl.num_programs(1) - 1)
    def _():
        h = jnp.maximum(acc_ref[...] + b1_ref[...], 0.0)
        logits = jnp.dot(h.astype(w_out_ref.dtype), w_out_ref[...],
                         preferred_element_type=jnp.float32)
        logits_ref[...] = logits + b_out_ref[...]


# --------------------------------------------------------------------------
# Parameter creation (true shapes, f32) and one-time prepare (pad + bf16 cast)
# --------------------------------------------------------------------------
def init_params(key, obs_feat_dim, action_repr_dim, hidden_dim, num_actions):
    k1, k2, k3 = jax.random.split(key, 3)
    return {
        "w_obs": jax.random.normal(k1, (obs_feat_dim, hidden_dim), jnp.float32)
                 / jnp.sqrt(obs_feat_dim),
        "w_act": jax.random.normal(k2, (action_repr_dim, hidden_dim),
                                   jnp.float32) / jnp.sqrt(action_repr_dim),
        "b1": jnp.zeros((1, hidden_dim), jnp.float32),
        "w_out": jax.random.normal(k3, (hidden_dim, num_actions), jnp.float32)
                 / jnp.sqrt(hidden_dim),
        "b_out": jnp.zeros((1, num_actions), jnp.float32),
    }


def prepare_params(params, *, single_step_w_in_bytes=8 * 1024 * 1024,
                   tk_tiled=2048):
    """Pad to lane/sublane-aligned shapes and cast weights to bf16 (once)."""
    w_in = jnp.concatenate([params["w_obs"], params["w_act"]], axis=0)  # [K,HID]
    K, HID = w_in.shape
    A = params["w_out"].shape[1]

    HID_pad = _round_up(HID, 128)
    A_pad = _round_up(A, 128)

    # Collapse the K reduction to a single step whenever the fused weight
    # matrix comfortably fits VMEM; otherwise tile K with a large tile.
    K_pad_min = _round_up(K, 128)
    if K_pad_min * HID_pad * 2 <= single_step_w_in_bytes:
        tk = K_pad_min
    else:
        tk = tk_tiled
    K_pad = _round_up(K, tk)

    w_in_p = jnp.zeros((K_pad, HID_pad), jnp.float32).at[:K, :HID].set(w_in)
    w_out_p = jnp.zeros((HID_pad, A_pad), jnp.float32).at[:HID, :A].set(
        params["w_out"])
    b1_p = jnp.zeros((1, HID_pad), jnp.float32).at[:, :HID].set(params["b1"])
    b_out_p = jnp.zeros((1, A_pad), jnp.float32).at[:, :A].set(params["b_out"])

    return {
        "w_in": w_in_p.astype(jnp.bfloat16),
        "w_out": w_out_p.astype(jnp.bfloat16),
        "b1": b1_p,
        "b_out": b_out_p,
        "tk": int(tk),
        "num_actions": int(A),
        "k_true": int(K),
    }


# --------------------------------------------------------------------------
# Forward wrapper (jit this together with its callers so pad/cast/concat fuse)
# --------------------------------------------------------------------------
def action_inverse_repr_forward(action_repr, observation, prepared):
    """action_repr: [B, D] f32; observation: [B, C, H, W] f32 (NCHW)."""
    w_in, b1, w_out, b_out = (prepared["w_in"], prepared["b1"],
                              prepared["w_out"], prepared["b_out"])
    tk = prepared["tk"]
    A = prepared["num_actions"]

    B = observation.shape[0]
    obs_flat = observation.reshape(B, -1)                       # [B, C*H*W]
    x = jnp.concatenate([obs_flat, action_repr], axis=-1)       # [B, K]
    K = x.shape[1]
    assert K == prepared["k_true"], (K, prepared["k_true"])

    K_pad, HID_pad = w_in.shape
    A_pad = w_out.shape[1]

    # Batch padded to dense bf16 vregs (16 sublanes); batch-tile for v7x's
    # two TensorCores when the batch is large.
    B_pad = _round_up(max(B, 16), 16)
    if B_pad <= 256:
        TM = B_pad
    else:
        TM = 256
        B_pad = _round_up(B_pad, TM)
    nb = B_pad // TM
    nk = K_pad // tk

    # Pad batch (sublanes) and K (lanes) with zeros; cast activations to bf16.
    x = jnp.pad(x, ((0, B_pad - B), (0, K_pad - K))).astype(jnp.bfloat16)

    itemsize = 2  # bf16
    cost = pl.CostEstimate(
        flops=2 * B_pad * K_pad * HID_pad + 2 * B_pad * HID_pad * A_pad,
        transcendentals=0,
        bytes_accessed=(B_pad * K_pad * itemsize        # x
                        + K_pad * HID_pad * itemsize    # w_in
                        + HID_pad * A_pad * itemsize    # w_out
                        + (HID_pad + A_pad) * 4         # biases
                        + B_pad * A_pad * 4),           # logits
    )

    if nk == 1:
        # ---- single K step: no accumulator, no init/finalize phases -------
        grid_spec = pltpu.PrefetchScalarGridSpec(
            num_scalar_prefetch=0,
            grid=(nb,),
            in_specs=[
                pl.BlockSpec((TM, K_pad), lambda i: (i, 0)),       # x
                pl.BlockSpec((K_pad, HID_pad), lambda i: (0, 0)),  # w_in
                pl.BlockSpec((1, HID_pad), lambda i: (0, 0)),      # b1
                pl.BlockSpec((HID_pad, A_pad), lambda i: (0, 0)),  # w_out
                pl.BlockSpec((1, A_pad), lambda i: (0, 0)),        # b_out
            ],
            out_specs=pl.BlockSpec((TM, A_pad), lambda i: (i, 0)),
            scratch_shapes=[],
        )
        kernel = _fused_mlp_single_kernel
        dims = ("parallel",)
    else:
        # ---- large-K fallback: K-tiled weight stream, x loaded once -------
        grid_spec = pltpu.PrefetchScalarGridSpec(
            num_scalar_prefetch=0,
            grid=(nb, nk),
            in_specs=[
                pl.BlockSpec((TM, K_pad), lambda i, k: (i, 0)),       # x (full K)
                pl.BlockSpec((tk, HID_pad), lambda i, k: (k, 0)),     # w_in tile
                pl.BlockSpec((1, HID_pad), lambda i, k: (0, 0)),      # b1
                pl.BlockSpec((HID_pad, A_pad), lambda i, k: (0, 0)),  # w_out
                pl.BlockSpec((1, A_pad), lambda i, k: (0, 0)),        # b_out
            ],
            out_specs=pl.BlockSpec((TM, A_pad), lambda i, k: (i, 0)),
            scratch_shapes=[pltpu.VMEM((TM, HID_pad), jnp.float32)],
        )
        kernel = functools.partial(_fused_mlp_ktiled_kernel, tk=tk)
        dims = ("parallel", "arbitrary")   # K is a reduction axis

    logits_pad = pl.pallas_call(
        kernel,
        out_shape=jax.ShapeDtypeStruct((B_pad, A_pad), jnp.float32),
        grid_spec=grid_spec,
        compiler_params=pltpu.CompilerParams(
            dimension_semantics=dims,
            vmem_limit_bytes=32 * 1024 * 1024,
        ),
        cost_estimate=cost,
    )(x, w_in, b1, w_out, b_out)

    return logits_pad[:B, :A]


# --------------------------------------------------------------------------
# References
# --------------------------------------------------------------------------
def reference_forward_f32(action_repr, observation, params):
    """Original (pure-f32) forward semantics."""
    B = observation.shape[0]
    obs_flat = observation.reshape(B, -1)
    h = obs_flat @ params["w_obs"] + action_repr @ params["w_act"] + params["b1"]
    h = jnp.maximum(h, 0.0)
    return h @ params["w_out"] + params["b_out"]


def reference_forward_bf16(action_repr, observation, params):
    """bf16-input / f32-accumulate reference matching the kernel's numerics."""
    B = observation.shape[0]
    obs_flat = observation.reshape(B, -1)
    x = jnp.concatenate([obs_flat, action_repr], axis=-1)
    xb = x.astype(jnp.bfloat16).astype(jnp.float32)
    w_in = jnp.concatenate([params["w_obs"], params["w_act"]], axis=0)
    w_in = w_in.astype(jnp.bfloat16).astype(jnp.float32)
    h = jnp.maximum(xb @ w_in + params["b1"], 0.0)
    hb = h.astype(jnp.bfloat16).astype(jnp.float32)
    w_out = params["w_out"].astype(jnp.bfloat16).astype(jnp.float32)
    return hb @ w_out + params["b_out"]


if __name__ == "__main__":
    key = jax.random.PRNGKey(0)
    k_obs, k_act, k_param = jax.random.split(key, 3)

    # Small, module-consistent shapes.
    B, C, H, W = 2, 4, 16, 16          # observation: NCHW image
    D = 32                             # action representation dim
    HID = 32                           # hidden dim
    A = 8                              # discrete action vocabulary size

    observation = jax.random.normal(k_obs, (B, C, H, W), jnp.float32)
    action_repr = jax.random.normal(k_act, (B, D), jnp.float32)

    params = init_params(k_param, C * H * W, D, HID, A)
    prepared = prepare_params(params)   # pad + bf16-cast once (single-K path)

    # Jit the wrapper so pad/cast/concat fuse with the pallas_call dispatch.
    fwd = jax.jit(lambda a, o: action_inverse_repr_forward(a, o, prepared))

    logits = jax.block_until_ready(fwd(action_repr, observation))
    assert logits.shape == (B, A), logits.shape

    # Tight check against the bf16-faithful reference.
    ref_bf16 = reference_forward_bf16(action_repr, observation, params)
    assert jnp.allclose(logits, ref_bf16, atol=1e-2, rtol=1e-2), (
        "mismatch vs bf16-faithful reference")

    # Loose check against the original f32 semantics (bf16 quantization error).
    ref_f32 = reference_forward_f32(action_repr, observation, params)
    assert jnp.allclose(logits, ref_f32, atol=1e-1, rtol=1e-1), (
        "mismatch vs pure-f32 reference")

    print("KERNEL_OK")
</pallas_src>

<mosaic_0001>
module attributes {stable_mosaic.version = 11 : i64} {
  func.func @_fused_mlp_single_kernel(%arg0: i32, %arg1: memref<16x1152xbf16, #tpu.memory_space<vmem>>, %arg2: memref<1152x128xbf16, #tpu.memory_space<vmem>>, %arg3: memref<1x128xf32, #tpu.memory_space<vmem>>, %arg4: memref<128x128xbf16, #tpu.memory_space<vmem>>, %arg5: memref<1x128xf32, #tpu.memory_space<vmem>>, %arg6: memref<16x128xf32, #tpu.memory_space<vmem>>) attributes {dimension_semantics = [#tpu.dimension_semantics<parallel>], iteration_bounds = array<i64: 1>, scalar_prefetch = 0 : i64, scratch_operands = 0 : i64, tpu.core_type = #tpu.core_type<tc>, window_params = [{transform_indices = @transform_0, window_bounds = array<i64: 16, 1152>}, {pipeline_mode = #tpu.pipeline_mode<synchronous>, transform_indices = @transform_1, window_bounds = array<i64: 1152, 128>}, {pipeline_mode = #tpu.pipeline_mode<synchronous>, transform_indices = @transform_2, window_bounds = array<i64: 1, 128>}, {pipeline_mode = #tpu.pipeline_mode<synchronous>, transform_indices = @transform_3, window_bounds = array<i64: 128, 128>}, {pipeline_mode = #tpu.pipeline_mode<synchronous>, transform_indices = @transform_4, window_bounds = array<i64: 1, 128>}, {transform_indices = @transform_5, window_bounds = array<i64: 16, 128>}]} {
    %c0 = arith.constant 0 : index
    %c0_0 = arith.constant 0 : index
    %0 = vector.load %arg1[%c0, %c0_0] : memref<16x1152xbf16, #tpu.memory_space<vmem>>, vector<16x1152xbf16>
    %c0_1 = arith.constant 0 : index
    %c0_2 = arith.constant 0 : index
    %1 = vector.load %arg2[%c0_1, %c0_2] : memref<1152x128xbf16, #tpu.memory_space<vmem>>, vector<1152x128xbf16>
    %cst = arith.constant dense<0.000000e+00> : vector<16x128xf32>
    %2 = tpu.matmul %0, %1, %cst {dimension_numbers = #tpu.dot_dimension_numbers<[1], [0], [0], [1], [0, 0, 1, 1], [], []>} : vector<16x1152xbf16>, vector<1152x128xbf16>, vector<16x128xf32> -> vector<16x128xf32>
    %c0_3 = arith.constant 0 : index
    %c0_4 = arith.constant 0 : index
    %3 = vector.load %arg3[%c0_3, %c0_4] : memref<1x128xf32, #tpu.memory_space<vmem>>, vector<1x128xf32>
    %4 = vector.broadcast %3 : vector<1x128xf32> to vector<16x128xf32>
    %5 = arith.addf %2, %4 : vector<16x128xf32>
    %cst_5 = arith.constant 0.000000e+00 : f32
    %6 = vector.broadcast %cst_5 : f32 to vector<16x128xf32>
    %7 = arith.maximumf %5, %6 : vector<16x128xf32>
    %8 = arith.truncf %7 : vector<16x128xf32> to vector<16x128xbf16>
    %c0_6 = arith.constant 0 : index
    %c0_7 = arith.constant 0 : index
    %9 = vector.load %arg4[%c0_6, %c0_7] : memref<128x128xbf16, #tpu.memory_space<vmem>>, vector<128x128xbf16>
    %cst_8 = arith.constant dense<0.000000e+00> : vector<16x128xf32>
    %10 = tpu.matmul %8, %9, %cst_8 {dimension_numbers = #tpu.dot_dimension_numbers<[1], [0], [0], [1], [0, 0, 1, 1], [], []>} : vector<16x128xbf16>, vector<128x128xbf16>, vector<16x128xf32> -> vector<16x128xf32>
    %c0_9 = arith.constant 0 : index
    %c0_10 = arith.constant 0 : index
    %11 = vector.load %arg5[%c0_9, %c0_10] : memref<1x128xf32, #tpu.memory_space<vmem>>, vector<1x128xf32>
    %12 = vector.broadcast %11 : vector<1x128xf32> to vector<16x128xf32>
    %13 = arith.addf %10, %12 : vector<16x128xf32>
    %c0_11 = arith.constant 0 : index
    %c0_12 = arith.constant 0 : index
    %14 = vector.load %arg6[%c0_11, %c0_12] : memref<16x128xf32, #tpu.memory_space<vmem>>, vector<16x128xf32>
    tpu.vector_store %arg6[%c0_11, %c0_12], %13 {strides = array<i32>} : memref<16x128xf32, #tpu.memory_space<vmem>>, vector<16x128xf32>,
    return
  }
  func.func @transform_0(%arg0: i32) -> (i32, i32) {
    %c0_i32 = arith.constant 0 : i32
    %c0_i32_0 = arith.constant 0 : i32
    return %arg0, %c0_i32 : i32, i32
  }
  func.func @transform_1(%arg0: i32) -> (i32, i32) {
    %c0_i32 = arith.constant 0 : i32
    %c0_i32_0 = arith.constant 0 : i32
    %c0_i32_1 = arith.constant 0 : i32
    return %c0_i32, %c0_i32_0 : i32, i32
  }
  func.func @transform_2(%arg0: i32) -> (i32, i32) {
    %c0_i32 = arith.constant 0 : i32
    %c0_i32_0 = arith.constant 0 : i32
    %c0_i32_1 = arith.constant 0 : i32
    return %c0_i32, %c0_i32_0 : i32, i32
  }
  func.func @transform_3(%arg0: i32) -> (i32, i32) {
    %c0_i32 = arith.constant 0 : i32
    %c0_i32_0 = arith.constant 0 : i32
    %c0_i32_1 = arith.constant 0 : i32
    return %c0_i32, %c0_i32_0 : i32, i32
  }
  func.func @transform_4(%arg0: i32) -> (i32, i32) {
    %c0_i32 = arith.constant 0 : i32
    %c0_i32_0 = arith.constant 0 : i32
    %c0_i32_1 = arith.constant 0 : i32
    return %c0_i32, %c0_i32_0 : i32, i32
  }
  func.func @transform_5(%arg0: i32) -> (i32, i32) {
    %c0_i32 = arith.constant 0 : i32
    %c0_i32_0 = arith.constant 0 : i32
    return %arg0, %c0_i32 : i32, i32
  }
}

</mosaic_0001>

<bundles_post_ra>
// kernel: _lambda_.1
= control target key start
LH: loop header
LB: loop body
LE: loop exit
PB: predicated region body
PF: predicated region fallthrough
CT: control target
= control target key end

     0   :  { %10 = vsyncpa [#allocation3], 0  ;;  %s1360_s18 = smov [#allocation2]   ;;  %s1470_s0 = inlined_call_operand.vmem [shape: bf16[16,1152], index: 0, kind: input, shape index: {}]   ;;  %s1471_s1 = inlined_call_operand.hbm [shape: bf16[1152,128], index: 1, kind: input, shape index: {}]   ;;  %s1472_s2 = inlined_call_operand.vmem [shape: f32[1,128], index: 2, kind: input, shape index: {}, may-alias: {2,4}]   ;;  %s1473_s3 = inlined_call_operand.vmem [shape: bf16[128,128], index: 3, kind: input, shape index: {}]   ;;  %s1474_s4 = inlined_call_operand.vmem [shape: f32[1,128], index: 4, kind: input, shape index: {}, may-alias: {2,4}]   ;;  %s1475_s5 = inlined_call_operand.vmem [shape: f32[16,128], index: 5, kind: output, shape index: {}]  }
   0x1   :  { %s18_s19 = sshll.u32 %s1360_s18, 4  ;;  %s1336_s22 = scalar_lea.hbm %s1471_s1, 9216  ;;  %s19_s19 = int_to_ptr.vmem [resolvable:$true] %s18_s19 }
   0x2   :  { %p1337_p0 = scmp.ne.s32.totalorder %s1471_s1, %s1336_s22  ;;  %p1340_p1 = scmp.lt.u32.totalorder %s1336_s22, %s1471_s1 }
   0x4   :  { %p1342_p2 = pnand %p1340_p1, %p1337_p0 }
   0x6   :  { %1345 = shalt.err (!%p1342_p2)
}
   0x7   :  { %s1346_s27 = scalar_lea.vmem %s19_s19, 9216  ;;  %p1351_p4 = scmp.lt.s32.totalorder %s19_s19, %s19_s19 }
   0x8   :  { %p1347_p3 = scmp.ne.s32.totalorder %s19_s19, %s1346_s27  ;;  %p1352_p5 = scmp.lt.s32.totalorder %s1346_s27, %s1346_s27 }
   0xa   :  { %p1353_p6 = por %p1352_p5, %p1351_p4 }
   0xc   :  { %p1354_p7 = pnand %p1353_p6, %p1347_p3 }
   0xe   :  { %1357 = shalt.err (!%p1354_p7)
}
   0xf   :  { %s1361_s28 = smov 64   ;;  %s1362_s29 = smov 4  }
  0x10   :  { %24 = dma.hbm_to_vmem [thread:$0]  %s1471_s1, 9216, %s19_s19, [#allocation3], %s1361_s28, %s1361_s28, %s1362_s29  }
  0x11   :  { %1358 = dma.done.wait [#allocation3], 9216  }
  0x12   :  { %1359 = vsyncadd [#allocation3], 4294958080  ;;  %v1243_v0 = vld [vmem:[#allocation2 + $0x40] sm:$0xff]   ;;  %v1247_v4 = vld [vmem:[#allocation2 + $0x48] sm:$0xff]   ;;  %vm1364_vm0 = vmmov 0  }
  0x13   :  { %v1244_v1 = vld [vmem:[#allocation2] sm:$0xff]   ;;  %1092 = vmatprep.subr.bf16.mxu0 %v1243_v0  ;;  %v1248_v5 = vld [vmem:[#allocation2 + $0x8] sm:$0xff]   ;;  %v1251_v8 = vld [vmem:[#allocation2 + $0x50] sm:$0xff]  }
  0x14   :  { %v1245_v2 = vld [vmem:[#allocation2 + $0xc0] sm:$0xff]   ;;  %1093 = vmatpush3.bf16.msra.mxu0 %v1244_v1  ;;  %v1249_v6 = vld [vmem:[#allocation2 + $0xc8] sm:$0xff]   ;;  %v1252_v9 = vld [vmem:[#allocation2 + $0x10] sm:$0xff]  }
  0x15   :  { %v1246_v3 = vld [vmem:[#allocation2 + $0x80] sm:$0xff]   ;;  %1114 = vmatprep.subr.bf16.mxu1 %v1245_v2  ;;  %1094 = vmatprep.subr.bf16.mxu0 %v1247_v4  ;;  %v1250_v7 = vld [vmem:[#allocation2 + $0x88] sm:$0xff]   ;;  %v1253_v10 = vld [vmem:[#allocation2 + $0xd0] sm:$0xff]  }
  0x16   :  { %1115 = vmatpush3.bf16.msra.mxu1 %v1246_v3  ;;  %v1254_v11 = vld [vmem:[#allocation2 + $0x90] sm:$0xff]   ;;  %v1255_v12 = vld [vmem:[#allocation2 + $0x58] sm:$0xff]   ;;  %v1259_v16 = vld [vmem:[#allocation2 + $0x60] sm:$0xff]  }
  0x17   :  { %1116 = vmatprep.subr.bf16.mxu1 %v1249_v6  ;;  %v1256_v13 = vld [vmem:[#allocation2 + $0x18] sm:$0xff]   ;;  %v1260_v17 = vld [vmem:[#allocation2 + $0x20] sm:$0xff]   ;;  %v1263_v20 = vld [vmem:[#allocation2 + $0x68] sm:$0xff]   ;;  %v1363_v6 = vmov 0.0  }
  0x18   :  { %1095 = vmatpush3.bf16.msra.mxu0 %v1248_v5  ;;  %v1257_v14 = vld [vmem:[#allocation2 + $0xd8] sm:$0xff]   ;;  %v1261_v18 = vld [vmem:[#allocation2 + $0xe0] sm:$0xff]   ;;  %v1264_v21 = vld [vmem:[#allocation2 + $0x28] sm:$0xff]  }
  0x19   :  { %1096 = vmatprep.subr.bf16.mxu0 %v1251_v8  ;;  %v1258_v15 = vld [vmem:[#allocation2 + $0x98] sm:$0xff]   ;;  %v1262_v19 = vld [vmem:[#allocation2 + $0xa0] sm:$0xff]   ;;  %v1265_v22 = vld [vmem:[#allocation2 + $0xe8] sm:$0xff]  }
  0x1a   :  { %1117 = vmatpush3.bf16.msra.mxu1 %v1250_v7  ;;  %v1266_v23 = vld [vmem:[#allocation2 + $0xa8] sm:$0xff]   ;;  %v1267_v24 = vld [vmem:[#allocation2 + $0x70] sm:$0xff]   ;;  %v1271_v28 = vld [vmem:[#allocation2 + $0x78] sm:$0xff]  }
  0x1b   :  { %1118 = vmatprep.subr.bf16.mxu1 %v1253_v10  ;;  %v1268_v25 = vld [vmem:[#allocation2 + $0x30] sm:$0xff]   ;;  %v1272_v29 = vld [vmem:[#allocation2 + $0x38] sm:$0xff]   ;;  %v1274_v31 = vld [vmem:[%s1470_s0] ss:$36 sps:$4 sm:$0xff]  }
  0x1c   :  { %1097 = vmatpush3.bf16.msra.mxu0 %v1252_v9  ;;  %v1269_v26 = vld [vmem:[#allocation2 + $0xf0] sm:$0xff]   ;;  %v1273_v30 = vld [vmem:[#allocation2 + $0xf8] sm:$0xff]   ;;  %v1276_v32 = vld [vmem:[%s1470_s0 + $0x4] ss:$36 sps:$4 sm:$0xff]  }
  0x1d   :  { %1098 = vmatprep.subr.bf16.mxu0 %v1255_v12  ;;  %v1270_v27 = vld [vmem:[#allocation2 + $0xb0] sm:$0xff]   ;;  %v1277_v33 = vld [vmem:[#allocation2 + $0xb8] sm:$0xff]   ;;  %706 = vmatprep.mubr.bf16.mxu0 %v1276_v32  ;;  %v1278_v34 = vld [vmem:[#allocation2 + $0x140] sm:$0xff]  }
  0x1e   :  { %1119 = vmatpush3.bf16.msra.mxu1 %v1254_v11  ;;  %v1279_v35 = vld [vmem:[%s1470_s0 + $0x8] ss:$36 sps:$4 sm:$0xff]   ;;  %v1282_v37 = vld [vmem:[#allocation2 + $0x100] sm:$0xff]   ;;  %v1289_v44 = vld [vmem:[#allocation2 + $0x150] sm:$0xff]  }
  0x1f   :  { %1120 = vmatprep.subr.bf16.mxu1 %v1257_v14  ;;  %v1281_v36 = vld [vmem:[%s1470_s0 + $0xc] ss:$36 sps:$4 sm:$0xff]   ;;  %v1283_v38 = vld [vmem:[#allocation2 + $0x1c0] sm:$0xff]   ;;  %v1293_v48 = vld [vmem:[#allocation2 + $0x158] sm:$0xff]  }
  0x20   :  { %1099 = vmatpush3.bf16.msra.mxu0 %v1256_v13  ;;  %747 = vmatprep.mubr.bf16.mxu1 %v1281_v36  ;;  %v1284_v39 = vld [vmem:[#allocation2 + $0x180] sm:$0xff]   ;;  %v1285_v40 = vld [vmem:[#allocation2 + $0x148] sm:$0xff]   ;;  %v1290_v45 = vld [vmem:[#allocation2 + $0x110] sm:$0xff]  }
  0x21   :  { %1100 = vmatprep.subr.bf16.mxu0 %v1259_v16  ;;  %v1286_v41 = vld [vmem:[#allocation2 + $0x108] sm:$0xff]   ;;  %v1291_v46 = vld [vmem:[#allocation2 + $0x1d0] sm:$0xff]   ;;  %v1294_v49 = vld [vmem:[#allocation2 + $0x118] sm:$0xff]  }
  0x22   :  { %1121 = vmatpush3.bf16.msra.mxu1 %v1258_v15  ;;  %v1287_v42 = vld [vmem:[#allocation2 + $0x1c8] sm:$0xff]   ;;  %v1292_v47 = vld [vmem:[#allocation2 + $0x190] sm:$0xff]   ;;  %v1295_v50 = vld [vmem:[#allocation2 + $0x1d8] sm:$0xff]  }
  0x23   :  { %1122 = vmatprep.subr.bf16.mxu1 %v1261_v18  ;;  %v1288_v43 = vld [vmem:[#allocation2 + $0x188] sm:$0xff]   ;;  %v1296_v51 = vld [vmem:[#allocation2 + $0x198] sm:$0xff]   ;;  %v1297_v52 = vld [vmem:[#allocation2 + $0x160] sm:$0xff]  }
  0x24   :  { %1101 = vmatpush3.bf16.msra.mxu0 %v1260_v17  ;;  %v1298_v53 = vld [vmem:[#allocation2 + $0x120] sm:$0xff]   ;;  %v1301_v56 = vld [vmem:[#allocation2 + $0x168] sm:$0xff]   ;;  %v1305_v60 = vld [vmem:[#allocation2 + $0x170] sm:$0xff]  }
  0x25   :  { %1102 = vmatprep.subr.bf16.mxu0 %v1263_v20  ;;  %v1299_v54 = vld [vmem:[#allocation2 + $0x1e0] sm:$0xff]   ;;  %v1302_v57 = vld [vmem:[#allocation2 + $0x128] sm:$0xff]   ;;  %v1306_v61 = vld [vmem:[#allocation2 + $0x130] sm:$0xff]  }
  0x26   :  { %1123 = vmatpush3.bf16.msra.mxu1 %v1262_v19  ;;  %v1300_v55 = vld [vmem:[#allocation2 + $0x1a0] sm:$0xff]   ;;  %v1303_v58 = vld [vmem:[#allocation2 + $0x1e8] sm:$0xff]   ;;  %v1307_v62 = vld [vmem:[#allocation2 + $0x1f0] sm:$0xff]  }
  0x27   :  { %1124 = vmatprep.subr.bf16.mxu1 %v1265_v22  ;;  %v1304_v59 = vld [vmem:[#allocation2 + $0x1a8] sm:$0xff]   ;;  %v1308_v63 = vld [vmem:[#allocation2 + $0x1b0] sm:$0xff]   ;;  %v1309_v0 = vld [vmem:[#allocation2 + $0x178] sm:$0xff]  }
  0x28   :  { %1103 = vmatpush3.bf16.msra.mxu0 %v1264_v21  ;;  %v1310_v1 = vld [vmem:[#allocation2 + $0x138] sm:$0xff]   ;;  %v1312_v3 = vld [vmem:[%s1470_s0 + $0x10] ss:$36 sps:$4 sm:$0xff]   ;;  %v1319_v9 = vld [vmem:[#allocation2 + $0x200] sm:$0xff]  }
  0x29   :  { %1104 = vmatprep.subr.bf16.mxu0 %v1267_v24  ;;  %v1311_v2 = vld [vmem:[#allocation2 + $0x1f8] sm:$0xff]   ;;  %v1320_v10 = vld [vmem:[#allocation2 + $0x208] sm:$0xff]   ;;  %v1321_v11 = vld [vmem:[#allocation2 + $0x210] sm:$0xff]  }
  0x2a   :  { %1125 = vmatpush3.bf16.msra.mxu1 %v1266_v23  ;;  %v1314_v4 = vld [vmem:[%s1470_s0 + $0x14] ss:$36 sps:$4 sm:$0xff]   ;;  %v1318_v8 = vld [vmem:[%s1470_s0 + $0x1c] ss:$36 sps:$4 sm:$0xff]   ;;  %v1324_v14 = vld [vmem:[#allocation2 + $0x228] sm:$0xff]  }
  0x2b   :  { %1126 = vmatprep.subr.bf16.mxu1 %v1269_v26  ;;  %v1315_v5 = vld [vmem:[#allocation2 + $0x1b8] sm:$0xff]   ;;  %v1323_v13 = vld [vmem:[#allocation2 + $0x220] sm:$0xff]   ;;  %v1325_v15 = vld [vmem:[#allocation2 + $0x230] sm:$0xff]  }
  0x2c   :  { %1105 = vmatpush3.bf16.msra.mxu0 %v1268_v25  ;;  %v1316_v7 = vld [vmem:[%s1470_s0 + $0x18] ss:$36 sps:$4 sm:$0xff]   ;;  %v1327_v17 = vld [vmem:[%s1470_s0 + $0x20] ss:$36 sps:$4 sm:$0xff]   ;;  %v1329_v19 = vld [vmem:[%s1473_s3 + $0x8] sm:$0xff]  }
  0x2d   :  { %1106 = vmatprep.subr.bf16.mxu0 %v1271_v28  ;;  %v1322_v12 = vld [vmem:[#allocation2 + $0x218] sm:$0xff]   ;;  %v1328_v18 = vld [vmem:[%s1473_s3] sm:$0xff]   ;;  %v1330_v20 = vld [vmem:[%s1473_s3 + $0x10] sm:$0xff]  }
  0x2e   :  { %1127 = vmatpush3.bf16.msra.mxu1 %v1270_v27  ;;  %v1326_v16 = vld [vmem:[#allocation2 + $0x238] sm:$0xff]   ;;  %v1332_v22 = vld [vmem:[%s1473_s3 + $0x20] sm:$0xff]   ;;  %v1333_v23 = vld [vmem:[%s1473_s3 + $0x28] sm:$0xff]  }
  0x2f   :  { %1128 = vmatprep.subr.bf16.mxu1 %v1273_v30  ;;  %v1331_v21 = vld [vmem:[%s1473_s3 + $0x18] sm:$0xff]   ;;  %v1334_v24 = vld [vmem:[%s1473_s3 + $0x30] sm:$0xff]   ;;  %v1001_v27 = vld [vmem:[%s1472_s2] ss:$0 sm:$0xff] }
  0x30   :  { %1107 = vmatpush3.bf16.msra.mxu0 %v1272_v29  ;;  %v1335_v25 = vld [vmem:[%s1473_s3 + $0x38] sm:$0xff]  }
  0x31   :  { %1136 = vmatprep.subr.bf16.mxu0 %v1278_v34 }
  0x32   :  { %1129 = vmatpush3.bf16.msra.mxu1 %v1277_v33 }
  0x33   :  { %707 = vmatmul.mubr.bf16.vlgmr.msra.gmra.mrb[0].mxu0 %v1274_v31  ;;  %1158 = vmatprep.subr.bf16.mxu1 %v1283_v38 }
  0x34   :  { %1137 = vmatpush3.bf16.msra.mxu0 %v1282_v37  ;;  %788 = vmatprep.mubr.bf16.mxu0 %v1314_v4  ;;  %v1083_v4 = vld [vmem:[%s1474_s4] ss:$0 sm:$0xff] }
  0x35   :  { %748 = vmatmul.mubr.bf16.vlgmr.msra.gmra.mrb[0].mxu1 %v1279_v35  ;;  %1138 = vmatprep.subr.bf16.mxu0 %v1285_v40 }
  0x36   :  { %1159 = vmatpush3.bf16.msra.mxu1 %v1284_v39  ;;  %829 = vmatprep.mubr.bf16.mxu1 %v1318_v8 }
  0x37   :  { %1160 = vmatprep.subr.bf16.mxu1 %v1287_v42 }
  0x38   :  { %1139 = vmatpush3.bf16.msra.mxu0 %v1286_v41 }
  0x39   :  { %1140 = vmatprep.subr.bf16.mxu0 %v1289_v44 }
  0x3a   :  { %1161 = vmatpush3.bf16.msra.mxu1 %v1288_v43 }
  0x3b   :  { %1162 = vmatprep.subr.bf16.mxu1 %v1291_v46 }
  0x3c   :  { %1141 = vmatpush3.bf16.msra.mxu0 %v1290_v45 }
  0x3d   :  { %1142 = vmatprep.subr.bf16.mxu0 %v1293_v48 }
  0x3e   :  { %1163 = vmatpush3.bf16.msra.mxu1 %v1292_v47 }
  0x3f   :  { %1164 = vmatprep.subr.bf16.mxu1 %v1295_v50 }
  0x40   :  { %1143 = vmatpush3.bf16.msra.mxu0 %v1294_v49 }
  0x41   :  { %1144 = vmatprep.subr.bf16.mxu0 %v1297_v52 }
  0x42   :  { %1165 = vmatpush3.bf16.msra.mxu1 %v1296_v51 }
  0x43   :  { %1166 = vmatprep.subr.bf16.mxu1 %v1299_v54 }
  0x44   :  { %1145 = vmatpush3.bf16.msra.mxu0 %v1298_v53 }
  0x45   :  { %1146 = vmatprep.subr.bf16.mxu0 %v1301_v56 }
  0x46   :  { %1167 = vmatpush3.bf16.msra.mxu1 %v1300_v55 }
  0x47   :  { %1168 = vmatprep.subr.bf16.mxu1 %v1303_v58 }
  0x48   :  { %1147 = vmatpush3.bf16.msra.mxu0 %v1302_v57 }
  0x49   :  { %1148 = vmatprep.subr.bf16.mxu0 %v1305_v60 }
  0x4a   :  { %1169 = vmatpush3.bf16.msra.mxu1 %v1304_v59 }
  0x4b   :  { %1170 = vmatprep.subr.bf16.mxu1 %v1307_v62 }
  0x4c   :  { %1149 = vmatpush3.bf16.msra.mxu0 %v1306_v61 }
  0x4d   :  { %1150 = vmatprep.subr.bf16.mxu0 %v1309_v0 }
  0x4e   :  { %1171 = vmatpush3.bf16.msra.mxu1 %v1308_v63 }
  0x4f   :  { %1172 = vmatprep.subr.bf16.mxu1 %v1311_v2 }
  0x50   :  { %1151 = vmatpush3.bf16.msra.mxu0 %v1310_v1 }
  0x51   :  { %1198 = vmatprep.subr.bf16.mxu0 %v1363_v6 }
  0x52   :  { %1173 = vmatpush3.bf16.msra.mxu1 %v1315_v5 }
  0x53   :  { %789 = vmatmul.mubr.bf16.vlgmr.msra.gmra.mrb[4].mxu0 %v1312_v3  ;;  %1218 = vmatprep.subr.bf16.mxu1 %v1363_v6 }
  0x54   :  { %1214 = vmatprep.mubr.msk.bf16.mxu0 %vm1364_vm0, %v1363_v6  ;;  %1199 = vmatpush3.bf16.msra.mxu0 %v1319_v9 }
  0x55   :  { %830 = vmatmul.mubr.bf16.vlgmr.msra.gmra.mrb[4].mxu1 %v1316_v7  ;;  %1200 = vmatprep.subr.bf16.mxu0 %v1363_v6 }
  0x56   :  { %1234 = vmatprep.mubr.msk.bf16.mxu1 %vm1364_vm0, %v1363_v6  ;;  %1219 = vmatpush3.bf16.msra.mxu1 %v1328_v18 }
  0x57   :  { %1220 = vmatprep.subr.bf16.mxu1 %v1363_v6 }
  0x58   :  { %1201 = vmatpush3.bf16.msra.mxu0 %v1320_v10 }
  0x59   :  { %1202 = vmatprep.subr.bf16.mxu0 %v1363_v6 }
  0x5a   :  { %1221 = vmatpush3.bf16.msra.mxu1 %v1329_v19 }
  0x5b   :  { %1222 = vmatprep.subr.bf16.mxu1 %v1363_v6 }
  0x5c   :  { %1203 = vmatpush3.bf16.msra.mxu0 %v1321_v11 }
  0x5d   :  { %1204 = vmatprep.subr.bf16.mxu0 %v1363_v6 }
  0x5e   :  { %1223 = vmatpush3.bf16.msra.mxu1 %v1330_v20 }
  0x5f   :  { %1224 = vmatprep.subr.bf16.mxu1 %v1363_v6 }
  0x60   :  { %1205 = vmatpush3.bf16.msra.mxu0 %v1322_v12 }
  0x61   :  { %1206 = vmatprep.subr.bf16.mxu0 %v1363_v6 }
  0x62   :  { %1225 = vmatpush3.bf16.msra.mxu1 %v1331_v21 }
  0x63   :  { %1226 = vmatprep.subr.bf16.mxu1 %v1363_v6 }
  0x64   :  { %1207 = vmatpush3.bf16.msra.mxu0 %v1323_v13 }
  0x65   :  { %1208 = vmatprep.subr.bf16.mxu0 %v1363_v6 }
  0x66   :  { %1227 = vmatpush3.bf16.msra.mxu1 %v1332_v22 }
  0x67   :  { %1228 = vmatprep.subr.bf16.mxu1 %v1363_v6 }
  0x68   :  { %1209 = vmatpush3.bf16.msra.mxu0 %v1324_v14 }
  0x69   :  { %1210 = vmatprep.subr.bf16.mxu0 %v1363_v6 }
  0x6a   :  { %1229 = vmatpush3.bf16.msra.mxu1 %v1333_v23 }
  0x6b   :  { %1230 = vmatprep.subr.bf16.mxu1 %v1363_v6 }
  0x6c   :  { %1211 = vmatpush3.bf16.msra.mxu0 %v1325_v15 }
  0x6d   :  { %1212 = vmatprep.subr.bf16.mxu0 %v1363_v6 }
  0x6e   :  { %1231 = vmatpush3.bf16.msra.mxu1 %v1334_v24 }
  0x6f   :  { %1232 = vmatprep.subr.bf16.mxu1 %v1363_v6 }
  0x70   :  { %1213 = vmatpush3.bf16.msra.mxu0 %v1326_v16 }
  0x72   :  { %1233 = vmatpush3.bf16.msra.mxu1 %v1335_v25 }
  0x73   :  { %1215 = vmatmul.mubr.bf16.vlgmr.msra.gmra.mrb[8].mxu0 %v1327_v17 }
 0x106   :  { %v1108_v26 = vpop.f32.mrb[0].mxu0 }
 0x107   :  { %v1109_v28 = vpop.f32.mrb[1].mxu0 }
 0x108   :  { %v1110_v29 = vadd.f32 %v1109_v28, %v1108_v26  ;;  %v1111_v30 = vpop.f32.mrb[2].mxu0  ;;  %v1130_v31 = vpop.f32.mrb[0].mxu1 }
 0x109   :  { %v1112_v32 = vpop.f32.mrb[3].mxu0  ;;  %v1131_v35 = vpop.f32.mrb[1].mxu1 }
 0x10a   :  { %v709_v33 = vadd.f32 %v1110_v29, %v1001_v27  ;;  %v1113_v34 = vadd.f32 %v1112_v32, %v1111_v30  ;;  %v1132_v36 = vadd.f32 %v1131_v35, %v1130_v31  ;;  %v1133_v37 = vpop.f32.mrb[2].mxu1 }
 0x10b   :  { %v1134_v39 = vpop.f32.mrb[3].mxu1 }
 0x10c   :  { %v712_v38 = vadd.f32 %v1113_v34, %v1001_v27  ;;  %v750_v40 = vadd.f32 %v1132_v36, %v709_v33  ;;  %v1135_v41 = vadd.f32 %v1134_v39, %v1133_v37 }
 0x10e   :  { %v753_v42 = vadd.f32 %v1135_v41, %v712_v38 }
 0x126   :  { %v1152_v43 = vpop.f32.mrb[4].mxu0 }
 0x127   :  { %v1153_v44 = vpop.f32.mrb[5].mxu0 }
 0x128   :  { %v1154_v45 = vadd.f32 %v1153_v44, %v1152_v43  ;;  %v1155_v46 = vpop.f32.mrb[6].mxu0  ;;  %v1174_v47 = vpop.f32.mrb[4].mxu1 }
 0x129   :  { %v1156_v48 = vpop.f32.mrb[7].mxu0  ;;  %v1175_v51 = vpop.f32.mrb[5].mxu1 }
 0x12a   :  { %v791_v49 = vadd.f32 %v1154_v45, %v750_v40  ;;  %v1157_v50 = vadd.f32 %v1156_v48, %v1155_v46  ;;  %v1176_v52 = vadd.f32 %v1175_v51, %v1174_v47  ;;  %v1177_v53 = vpop.f32.mrb[6].mxu1 }
 0x12b   :  { %v1178_v55 = vpop.f32.mrb[7].mxu1 }
 0x12c   :  { %v794_v54 = vadd.f32 %v1157_v50, %v753_v42  ;;  %v1179_v56 = vadd.f32 %v1178_v55, %v1177_v53  ;;  %v832_v57 = vadd.f32 %v1176_v52, %v791_v49 }
 0x12e   :  { %v835_v58 = vadd.f32 %v1179_v56, %v794_v54 }
 0x146   :  { %v872_v59 = vpop.f32.mrb[8].mxu0 }
 0x147   :  { %v873_v60 = vadd.f32 %v872_v59, %v832_v57  ;;  %v1216_v61 = vpop.f32.mrb[9].mxu0 }
 0x148   :  { %v875_v62 = vpop.f32.mrb[10].mxu0 }
 0x149   :  { %v876_v63 = vadd.f32 %v875_v62, %v835_v58  ;;  %v1217_v0 = vpop.f32.mrb[11].mxu0  ;;  %v879_v1 = vmax.f32 %v873_v60, 0.0 }
 0x14b   :  { %v880_v2 = vmax.f32 %v876_v63, 0.0 }
 0x14d   :  { %v881_v3 = vpack.c.bf16 %v880_v2, %v879_v1 }
 0x14f   :  { %1235 = vmatmul.mubr.bf16.vlgmr.msra.gmra.mrb[8].mxu1 %v881_v3 }
 0x222   :  { %v987_v5 = vpop.f32.mrb[8].mxu1 }
 0x223   :  { %v988_v6 = vadd.f32 %v1083_v4, %v987_v5  ;;  %v1236_v7 = vpop.f32.mrb[9].mxu1 }
 0x224   :  { %v990_v8 = vpop.f32.mrb[10].mxu1 }
 0x225   :  { %994 = vst [vmem:[%s1475_s5] sm:$0xff] %v988_v6  ;;  %v991_v9 = vadd.f32 %v1083_v4, %v990_v8  ;;  %v1237_v10 = vpop.f32.mrb[11].mxu1 }
 0x227   :  { %995 = vst [vmem:[%s1475_s5 + $0x8] sm:$0xff] %v991_v9 }
 0x228   :  { %1000 = vsyncpa [#allocation3], 1 }

</bundles_post_ra>
